<compile_context>
chip_gen: v7x
topology: tpu7x:2x2x1
jax: 0.10.0
libtpu: 0.0.40
codegen_flags: <defaults>
</compile_context>

<pallas_src>
from functools import partial

import numpy as np
import jax
import jax.numpy as jnp
from jax import lax
from jax.experimental import pallas as pl
from jax.experimental.pallas import tpu as pltpu


def _features_embedding_kernel(x_ref, off_ref, texp_ref, out_ref, *, precision):
    """One grid step = TB batch rows.

    x_ref    : (TB, F)   int32  VMEM index tile
    off_ref  : (1, F)    int32  VMEM field offsets
    texp_ref : (V, F*D)  float  field-expanded table (whole, VMEM resident)
    out_ref  : (TB, F*D) float  lane-dense output block
    """
    tb, num_fields = x_ref.shape
    vocab = texp_ref.shape[0]

    idx = x_ref[...] + off_ref[...]                        # (TB, F): one VPU add
    col = lax.broadcasted_iota(jnp.int32, (tb, vocab), 1)  # (TB, V) vocab iota

    # Multi-hot over the global vocab: fields occupy disjoint global-index
    # ranges, so OR-ing the F per-field one-hots never collides for in-range
    # inputs.  F compares of one (TB, V) tile; the running OR keeps only two
    # boolean tiles live (no parts list / concat, minimal vreg pressure).
    hot = col == idx[:, 0:1]
    for fld in range(1, num_fields):                       # static, F is tiny
        hot = hot | (col == idx[:, fld:fld + 1])

    # Single MXU matmul emits the full lane-dense (TB, F*D) block: column slab
    # f*D:(f+1)*D of texp is zero outside field f's row range, so each slab
    # selects exactly that field's embedding row.
    out_ref[...] = jnp.dot(
        hot.astype(texp_ref.dtype), texp_ref[...],
        preferred_element_type=jnp.float32,
        precision=precision).astype(out_ref.dtype)


def _round_up(n, m):
    return ((n + m - 1) // m) * m


def make_expanded_table(table, offsets):
    """(V, D) table -> (V, F*D) field-expanded table.

    Column slab f*D:(f+1)*D holds table[g] for global rows g in field f's range
    [offsets[f], offsets[f+1]) and zeros elsewhere.  One-time prep (analogous to
    module init); multiplying by an exact 0/1 mask preserves values bit-exactly.
    """
    v, d = table.shape
    f = offsets.shape[0]
    starts = offsets.astype(jnp.int32)
    ends = jnp.concatenate([starts[1:], jnp.array([v], dtype=jnp.int32)])
    g = jnp.arange(v, dtype=jnp.int32)[:, None]            # (V, 1)
    mask = (g >= starts[None, :]) & (g < ends[None, :])    # (V, F)
    t_exp = mask.astype(table.dtype)[:, :, None] * table[:, None, :]  # (V, F, D)
    return t_exp.reshape(v, f * d)


def features_embedding(x, offsets, table, *, batch_tile=512):
    """x: (B, F) int, offsets: (F,) int, table: (V, D) -> (B, F, D)."""
    b, f = x.shape
    v, d = table.shape
    assert v < 2**31, "int32 indices require sum(field_dims) < 2**31"

    # Batch tile: multiple of 8 sublanes, capped by the (padded) batch size.
    tb = min(batch_tile, _round_up(b, 8))
    b_pad = _round_up(b, tb)
    if b_pad != b:
        # Padded rows use index 0 (valid for every field); sliced off below.
        x = jnp.pad(x, ((0, b_pad - b), (0, 0)))

    x = x.astype(jnp.int32)
    off2d = offsets.reshape(1, f).astype(jnp.int32)
    t_exp = make_expanded_table(table, offsets)            # (V, F*D), prep once

    # f32 tables need HIGHEST so the one-hot matmul is a bit-exact gather; a
    # bf16 table passes through exactly at DEFAULT (f32 accumulate) with ~3x
    # fewer MXU passes and half the table VMEM.
    precision = (lax.Precision.HIGHEST if table.dtype == jnp.float32
                 else lax.Precision.DEFAULT)

    # TODO(synk): for vocabularies whose (V, F*D) expanded table does not fit the
    # scoped VMEM budget (esp. v7x's 64 MiB), switch the table to
    # memory_space=pl.ANY + a manual double-buffered make_async_copy row gather
    # (DMA-bound -- the true roofline for an embedding lookup); if it stays
    # VMEM-resident but large, single-buffer the grid-invariant table
    # (pipeline_mode=pl.Buffered(1)) and raise vmem_limit_bytes.
    out_flat = pl.pallas_call(
        partial(_features_embedding_kernel, precision=precision),
        out_shape=jax.ShapeDtypeStruct((b_pad, f * d), table.dtype),
        grid=(b_pad // tb,),
        in_specs=[
            pl.BlockSpec((tb, f), lambda i: (i, 0)),       # index tile (VMEM)
            pl.BlockSpec((1, f), lambda i: (0, 0)),        # offsets (VMEM)
            pl.BlockSpec((v, f * d), lambda i: (0, 0)),    # expanded table, resident
        ],
        out_specs=pl.BlockSpec((tb, f * d), lambda i: (i, 0)),
        compiler_params=pltpu.CompilerParams(
            dimension_semantics=("parallel",)),            # megacore on v7x
    )(x, off2d, t_exp)

    return out_flat[:b].reshape(b, f, d)


if __name__ == "__main__":
    # Module configuration (matches FeaturesEmbedding.__init__).
    field_dims = np.array([10, 20, 30, 40], dtype=np.int64)
    embed_dim = 32
    vocab = int(field_dims.sum())
    num_fields = int(field_dims.shape[0])

    # offsets = (0, *cumsum(field_dims)[:-1])
    offsets = jnp.asarray(
        np.array((0, *np.cumsum(field_dims)[:-1]), dtype=np.int32))

    key = jax.random.PRNGKey(0)
    k_w, k_x = jax.random.split(key)

    # xavier_uniform_ on a (vocab, embed_dim) weight: U(-a, a), a = sqrt(6/(fan_in+fan_out))
    bound = float(np.sqrt(6.0 / (vocab + embed_dim)))
    table = jax.random.uniform(
        k_w, (vocab, embed_dim), dtype=jnp.float32, minval=-bound, maxval=bound)

    def make_x(batch):
        cols = []
        for fld in range(num_fields):
            kf = jax.random.fold_in(k_x, fld * 1000 + batch)
            cols.append(jax.random.randint(
                kf, (batch,), 0, int(field_dims[fld]), dtype=jnp.int32))
        return jnp.stack(cols, axis=1)                     # (batch, num_fields)

    # batch=2: the module-spec small shape; batch=523: exercises batch padding
    # and multiple 512-row grid tiles.
    for batch in (2, 523):
        x = make_x(batch)
        out = jax.block_until_ready(features_embedding(x, offsets, table))

        # Pure-JAX reference: embedding(x + offsets).
        ref = table[x + offsets[None, :]]
        assert out.shape == (batch, num_fields, embed_dim)
        np.testing.assert_allclose(np.asarray(out), np.asarray(ref),
                                   rtol=1e-6, atol=1e-6)

    print("KERNEL_OK")
</pallas_src>

<mosaic_0001>
module attributes {stable_mosaic.version = 11 : i64} {
  func.func @_features_embedding_kernel(%arg0: i32, %arg1: memref<8x4xi32, #tpu.memory_space<vmem>>, %arg2: memref<1x4xi32, #tpu.memory_space<vmem>>, %arg3: memref<100x128xf32, #tpu.memory_space<vmem>>, %arg4: memref<8x128xf32, #tpu.memory_space<vmem>>) attributes {dimension_semantics = [#tpu.dimension_semantics<parallel>], iteration_bounds = array<i64: 1>, scalar_prefetch = 0 : i64, scratch_operands = 0 : i64, tpu.core_type = #tpu.core_type<tc>, window_params = [{transform_indices = @transform_0, window_bounds = array<i64: 8, 4>}, {pipeline_mode = #tpu.pipeline_mode<synchronous>, transform_indices = @transform_1, window_bounds = array<i64: 1, 4>}, {pipeline_mode = #tpu.pipeline_mode<synchronous>, transform_indices = @transform_2, window_bounds = array<i64: 100, 128>}, {transform_indices = @transform_3, window_bounds = array<i64: 8, 128>}]} {
    %c0 = arith.constant 0 : index
    %c0_0 = arith.constant 0 : index
    %0 = vector.load %arg1[%c0, %c0_0] : memref<8x4xi32, #tpu.memory_space<vmem>>, vector<8x4xi32>
    %c0_1 = arith.constant 0 : index
    %c0_2 = arith.constant 0 : index
    %1 = vector.load %arg2[%c0_1, %c0_2] : memref<1x4xi32, #tpu.memory_space<vmem>>, vector<1x4xi32>
    %2 = vector.broadcast %1 : vector<1x4xi32> to vector<8x4xi32>
    %3 = arith.addi %0, %2 : vector<8x4xi32>
    %4 = tpu.iota {dimensions = array<i32: 1>} : vector<8x100xi32>
    %5 = vector.extract_strided_slice %3 {offsets = [0, 0], sizes = [8, 1], strides = [1, 1]} : vector<8x4xi32> to vector<8x1xi32>
    %6 = vector.broadcast %5 : vector<8x1xi32> to vector<8x100xi32>
    %7 = arith.cmpi eq, %4, %6 : vector<8x100xi32>
    %8 = vector.extract_strided_slice %3 {offsets = [0, 1], sizes = [8, 1], strides = [1, 1]} : vector<8x4xi32> to vector<8x1xi32>
    %9 = vector.broadcast %8 : vector<8x1xi32> to vector<8x100xi32>
    %10 = arith.cmpi eq, %4, %9 : vector<8x100xi32>
    %11 = arith.ori %7, %10 : vector<8x100xi1>
    %12 = vector.extract_strided_slice %3 {offsets = [0, 2], sizes = [8, 1], strides = [1, 1]} : vector<8x4xi32> to vector<8x1xi32>
    %13 = vector.broadcast %12 : vector<8x1xi32> to vector<8x100xi32>
    %14 = arith.cmpi eq, %4, %13 : vector<8x100xi32>
    %15 = arith.ori %11, %14 : vector<8x100xi1>
    %16 = vector.extract_strided_slice %3 {offsets = [0, 3], sizes = [8, 1], strides = [1, 1]} : vector<8x4xi32> to vector<8x1xi32>
    %17 = vector.broadcast %16 : vector<8x1xi32> to vector<8x100xi32>
    %18 = arith.cmpi eq, %4, %17 : vector<8x100xi32>
    %19 = arith.ori %15, %18 : vector<8x100xi1>
    %20 = arith.extui %19 : vector<8x100xi1> to vector<8x100xi32>
    %21 = arith.sitofp %20 : vector<8x100xi32> to vector<8x100xf32>
    %c0_3 = arith.constant 0 : index
    %c0_4 = arith.constant 0 : index
    %22 = vector.load %arg3[%c0_3, %c0_4] : memref<100x128xf32, #tpu.memory_space<vmem>>, vector<100x128xf32>
    %cst = arith.constant dense<0.000000e+00> : vector<8x128xf32>
    %23 = tpu.matmul %21, %22, %cst {dimension_numbers = #tpu.dot_dimension_numbers<[1], [0], [0], [1], [0, 0, 1, 1], [], []>, precision = #tpu.contract_precision<fp32>} : vector<8x100xf32>, vector<100x128xf32>, vector<8x128xf32> -> vector<8x128xf32>
    %c0_5 = arith.constant 0 : index
    %c0_6 = arith.constant 0 : index
    %24 = vector.load %arg4[%c0_5, %c0_6] : memref<8x128xf32, #tpu.memory_space<vmem>>, vector<8x128xf32>
    tpu.vector_store %arg4[%c0_5, %c0_6], %23 {strides = array<i32>} : memref<8x128xf32, #tpu.memory_space<vmem>>, vector<8x128xf32>,
    return
  }
  func.func @transform_0(%arg0: i32) -> (i32, i32) {
    %c0_i32 = arith.constant 0 : i32
    %c0_i32_0 = arith.constant 0 : i32
    return %arg0, %c0_i32 : i32, i32
  }
  func.func @transform_1(%arg0: i32) -> (i32, i32) {
    %c0_i32 = arith.constant 0 : i32
    %c0_i32_0 = arith.constant 0 : i32
    %c0_i32_1 = arith.constant 0 : i32
    return %c0_i32, %c0_i32_0 : i32, i32
  }
  func.func @transform_2(%arg0: i32) -> (i32, i32) {
    %c0_i32 = arith.constant 0 : i32
    %c0_i32_0 = arith.constant 0 : i32
    %c0_i32_1 = arith.constant 0 : i32
    return %c0_i32, %c0_i32_0 : i32, i32
  }
  func.func @transform_3(%arg0: i32) -> (i32, i32) {
    %c0_i32 = arith.constant 0 : i32
    %c0_i32_0 = arith.constant 0 : i32
    return %arg0, %c0_i32 : i32, i32
  }
}

</mosaic_0001>

<bundles_post_ra>
// kernel: tpu_custom_call.1
= control target key start
LH: loop header
LB: loop body
LE: loop exit
PB: predicated region body
PF: predicated region fallthrough
CT: control target
= control target key end

     0   :  { %8 = vsyncpa [#allocation3], 0  ;;  %s1412_s0 = inlined_call_operand.vmem [shape: s32[8,4], index: 0, kind: input, shape index: {}]   ;;  %s1413_s1 = inlined_call_operand.vmem [shape: s32[1,4], index: 1, kind: input, shape index: {}]   ;;  %s1414_s2 = inlined_call_operand.hbm [shape: f32[100,128], index: 2, kind: input, shape index: {}]   ;;  %s1415_s3 = inlined_call_operand.hbm [shape: f32[8,128], index: 3, kind: output, shape index: {}]  }
   0x1   :  { %9 = vsyncpa [#allocation4], 0  ;;  %s1142_s12 = smov [#allocation2]   ;;  %s1094_s16 = scalar_lea.hbm %s1414_s2, 1664 }
   0x2   :  { %s19_s13 = sshll.u32 %s1142_s12, 4  ;;  %p1095_p0 = scmp.ne.s32.totalorder %s1414_s2, %s1094_s16  ;;  %s20_s13 = int_to_ptr.vmem [resolvable:$true] %s19_s13 }
   0x3   :  { %p1098_p1 = scmp.lt.u32.totalorder %s1094_s16, %s1414_s2 }
   0x5   :  { %p1100_p2 = pnand %p1098_p1, %p1095_p0 }
   0x7   :  { %1103 = shalt.err (!%p1100_p2)
}
   0x8   :  { %s1104_s21 = scalar_lea.vmem %s20_s13, 1664  ;;  %p1109_p4 = scmp.lt.s32.totalorder %s20_s13, %s20_s13 }
   0x9   :  { %p1105_p3 = scmp.ne.s32.totalorder %s20_s13, %s1104_s21  ;;  %p1110_p5 = scmp.lt.s32.totalorder %s1104_s21, %s1104_s21 }
   0xb   :  { %p1111_p6 = por %p1110_p5, %p1109_p4 }
   0xd   :  { %p1112_p7 = pnand %p1111_p6, %p1105_p3 }
   0xf   :  { %1115 = shalt.err (!%p1112_p7)
}
  0x10   :  { %s1143_s22 = smov 128   ;;  %s1144_s23 = smov 8  }
  0x11   :  { %25 = dma.hbm_to_vmem [thread:$0]  %s1414_s2, 1664, %s20_s13, [#allocation3], %s1143_s22, %s1143_s22, %s1144_s23  }
  0x12   :  { %1138 = dma.done.wait [#allocation3], 1664  }
  0x13   :  { %1139 = vsyncadd [#allocation3], 4294965632  ;;  %v1145_v0 = vmov 0   ;;  %v1146_v1 = vmov 2   ;;  %v1147_v2 = vmov 0.0|0.0   ;;  %v29_v3 = vld [vmem:[%s1412_s0] sm:$0xff] }
  0x14   :  { %1089 = vset.pattern.permute.xlu0 %v1145_v0  ;;  %1091 = vset.pattern.permute.xlu1 %v1146_v1  ;;  %v698_v4 = vld [vmem:[%s1413_s1] ss:$0 sm:$0xff]  ;;  %v59_v5 = vld [vmem:[#allocation2] sm:$0xff]  ;;  %v60_v7 = vld [vmem:[#allocation2 + $0x8] sm:$0xff]  ;;  %v1148_v33 = vmov 1   ;;  %v1149_v34 = vmov 3  }
  0x15   :  { %1015 = vmatprep.subr.bf16.mxu0 %v1147_v2  ;;  %961 = vmatprep.subr.bf16.mxu1 %v1147_v2  ;;  %v35_v6 = vadd.s32 %v698_v4, %v29_v3  ;;  %v81_v8 = vand.u32 4294901760, %v59_v5  ;;  %v61_v9 = vld [vmem:[#allocation2 + $0x10] sm:$0xff]  ;;  %v62_v10 = vld [vmem:[#allocation2 + $0x18] sm:$0xff]  ;;  %v84_v11 = vand.u32 4294901760, %v60_v7  ;;  %v63_v14 = vld [vmem:[#allocation2 + $0x20] sm:$0xff]  ;;  %vm1150_vm0 = vmmov 0  }
  0x16   :  { %v87_v12 = vand.u32 4294901760, %v61_v9  ;;  %v90_v13 = vand.u32 4294901760, %v62_v10  ;;  %v64_v15 = vld [vmem:[#allocation2 + $0x28] sm:$0xff]  ;;  %v65_v16 = vld [vmem:[#allocation2 + $0x30] sm:$0xff]  ;;  %v93_v18 = vand.u32 4294901760, %v63_v14  ;;  %v66_v20 = vld [vmem:[#allocation2 + $0x38] sm:$0xff] }
  0x17   :  { %39 = vperm.xlu0 %1089, %v35_v6   ;;  %48 = vperm.xlu1 %1091, %v35_v6   ;;  %v1193_v17 = vsub.f32 %v59_v5, %v81_v8  ;;  %v96_v19 = vand.u32 4294901760, %v64_v15  ;;  %v1195_v21 = vpack.c.bf16 %v84_v11, %v81_v8  ;;  %v1197_v22 = vsub.f32 %v60_v7, %v84_v11  ;;  %v67_v25 = vld [vmem:[#allocation2 + $0x40] sm:$0xff]  ;;  %v68_v26 = vld [vmem:[#allocation2 + $0x48] sm:$0xff]  ;;  %v69_v40 = vld [vmem:[#allocation2 + $0x50] sm:$0xff]  ;;  %s1152_s0 = smov [#allocation5]  }
  0x18   :  { %v1199_v23 = vsub.f32 %v61_v9, %v87_v12  ;;  %v99_v24 = vand.u32 4294901760, %v65_v16  ;;  %v1201_v27 = vsub.f32 %v62_v10, %v90_v13  ;;  %v1203_v28 = vsub.f32 %v63_v14, %v93_v18  ;;  %v70_v41 = vld [vmem:[#allocation2 + $0x58] sm:$0xff]  ;;  %v71_v55 = vld [vmem:[#allocation2 + $0x60] sm:$0xf]  ;;  %s689_s1 = sshll.u32 %s1152_s0, 4  ;;  %s690_s1 = int_to_ptr.vmem [resolvable:$true] %s689_s1 }
  0x19   :  { %v1205_v29 = vsub.f32 %v64_v15, %v96_v19  ;;  %1017 = vmatpush3.bf16.msra.mxu0 %v1195_v21  ;;  %963 = vmatpush3.bf16.msra.mxu1 %v1195_v21  ;;  %v1209_v30 = vpack.c.bf16 %v90_v13, %v87_v12  ;;  %v102_v31 = vand.u32 4294901760, %v66_v20  ;;  %v105_v35 = vand.u32 4294901760, %v67_v25  ;;  %s1116_s2 = scalar_lea.vmem %s690_s1, 128  ;;  %p1121_p9 = scmp.lt.s32.totalorder %s690_s1, %s690_s1 }
  0x1a   :  { %v1211_v32 = vsub.f32 %v65_v16, %v99_v24  ;;  %v108_v36 = vand.u32 4294901760, %v68_v26  ;;  %1018 = vmatprep.subr.bf16.mxu0 %v1147_v2  ;;  %964 = vmatprep.subr.bf16.mxu1 %v1147_v2  ;;  %v1223_v42 = vpack.c.bf16 %v96_v19, %v93_v18  ;;  %v111_v43 = vand.u32 4294901760, %v69_v40  ;;  %p1117_p8 = scmp.ne.s32.totalorder %s690_s1, %s1116_s2  ;;  %p1122_p10 = scmp.lt.s32.totalorder %s1116_s2, %s1116_s2 }
  0x1b   :  { %1090 = vset.pattern.permute.xlu0 %v1148_v33  ;;  %1092 = vset.pattern.permute.xlu1 %v1149_v34  ;;  %v1213_v37 = vsub.f32 %v66_v20, %v102_v31  ;;  %v1217_v38 = vsub.f32 %v67_v25, %v105_v35  ;;  %v114_v44 = vand.u32 4294901760, %v70_v41  ;;  %v1229_v45 = vpack.c.bf16 %v102_v31, %v99_v24 }
  0x1c   :  { %43 = vperm.xlu0 %1090, %v35_v6   ;;  %53 = vperm.xlu1 %1092, %v35_v6   ;;  %v1219_v39 = vsub.f32 %v68_v26, %v108_v36  ;;  %v1231_v46 = vsub.f32 %v69_v40, %v111_v43  ;;  %v171_v48 = vand.u32 4294901760, %v1193_v17  ;;  %v178_v49 = vand.u32 4294901760, %v1197_v22  ;;  %p1123_p11 = por %p1122_p10, %p1121_p9 }
  0x1d   :  { %1020 = vmatpush3.bf16.msra.mxu0 %v1209_v30  ;;  %966 = vmatpush3.bf16.msra.mxu1 %v1209_v30  ;;  %v1233_v47 = vsub.f32 %v70_v41, %v114_v44  ;;  %v1151_v50 = vmov 0.0   ;;  %v1249_v54 = vpack.c.bf16 %v108_v36, %v105_v35  ;;  %vm76_vm1 = vcmask 1043456  }
  0x1e   :  { %1021 = vmatprep.subr.bf16.mxu0 %v1147_v2  ;;  %967 = vmatprep.subr.bf16.mxu1 %v1147_v2  ;;  %v1243_v51 = vpack.c.bf16 %v178_v49, %v171_v48  ;;  %v172_v52 = vsub.f32 %v1193_v17, %v171_v48  ;;  %v179_v53 = vsub.f32 %v1197_v22, %v178_v49  ;;  %v185_v58 = vand.u32 4294901760, %v1199_v23  ;;  %p1124_p12 = pnand %p1123_p11, %p1117_p8 }
  0x1f   :  { %900 = vmatprep.mubr.msk.f32.mxu0 %vm1150_vm0, %v1151_v50  ;;  %813 = vmatprep.mubr.msk.f32.mxu1 %vm1150_vm0, %v1151_v50  ;;  %v192_v59 = vand.u32 4294901760, %v1201_v27  ;;  %v1263_v0 = vpack.c.bf16 %v114_v44, %v111_v43  ;;  %v1265_v1 = vsel %vm76_vm1, %v71_v55, 0  ;;  %v199_v5 = vand.u32 4294901760, %v1203_v28 }
  0x20   :  { %1093 = vset.pattern.permute.xlu0 %v1149_v34  ;;  %v173_v56 = vand.u32 4294901760, %v172_v52  ;;  %v180_v57 = vand.u32 4294901760, %v179_v53  ;;  %v186_v62 = vsub.f32 %v1199_v23, %v185_v58  ;;  %v206_v6 = vand.u32 4294901760, %v1205_v29 }
  0x21   :  { %1023 = vmatpush3.bf16.msra.mxu0 %v1223_v42  ;;  %969 = vmatpush3.bf16.msra.mxu1 %v1223_v42  ;;  %v1257_v61 = vpack.c.bf16 %v192_v59, %v185_v58  ;;  %v193_v63 = vsub.f32 %v1201_v27, %v192_v59  ;;  %v200_v9 = vsub.f32 %v1203_v28, %v199_v5  ;;  %v1280_v11 = vand.u32 4294901760, %v1265_v1 }
  0x22   :  { %1024 = vmatprep.subr.bf16.mxu0 %v1147_v2  ;;  %970 = vmatprep.subr.bf16.mxu1 %v1147_v2  ;;  %v1255_v60 = vpack.c.bf16 %v180_v57, %v173_v56  ;;  %v187_v3 = vand.u32 4294901760, %v186_v62  ;;  %v1273_v8 = vpack.c.bf16 %v206_v6, %v199_v5  ;;  %v207_v10 = vsub.f32 %v1205_v29, %v206_v6 }
  0x23   :  { %v194_v4 = vand.u32 4294901760, %v193_v63  ;;  %v201_v12 = vand.u32 4294901760, %v200_v9  ;;  %v213_v14 = vand.u32 4294901760, %v1211_v32  ;;  %v220_v15 = vand.u32 4294901760, %v1213_v37 }
  0x24   :  { %v208_v13 = vand.u32 4294901760, %v207_v10  ;;  %v227_v26 = vand.u32 4294901760, %v1217_v38  ;;  %v234_v31 = vand.u32 4294901760, %v1219_v39  ;;  %v241_v43 = vand.u32 4294901760, %v1231_v46 }
  0x25   :  { %1026 = vmatpush3.bf16.msra.mxu0 %v1229_v45  ;;  %972 = vmatpush3.bf16.msra.mxu1 %v1229_v45  ;;  %v1271_v7 = vpack.c.bf16 %v194_v4, %v187_v3  ;;  %v1288_v18 = vpack.c.bf16 %v220_v15, %v213_v14  ;;  %v214_v19 = vsub.f32 %v1211_v32, %v213_v14  ;;  %v248_v44 = vand.u32 4294901760, %v1233_v47 }
  0x26   :  { %1027 = vmatprep.subr.bf16.mxu0 %v1147_v2  ;;  %973 = vmatprep.subr.bf16.mxu1 %v1147_v2  ;;  %v1286_v16 = vpack.c.bf16 %v208_v13, %v201_v12  ;;  %v221_v20 = vsub.f32 %v1213_v37, %v220_v15  ;;  %v1046_v34 = vpack.c.bf16 %v234_v31, %v227_v26  ;;  %v36_v5 = vlaneseq }
  0x27   :  { %v215_v24 = vand.u32 4294901760, %v214_v19  ;;  %v228_v35 = vsub.f32 %v1217_v38, %v227_v26  ;;  %v235_v36 = vsub.f32 %v1219_v39, %v234_v31  ;;  %v1049_v49 = vpack.c.bf16 %v248_v44, %v241_v43 }
  0x28   :  { %v222_v25 = vand.u32 4294901760, %v221_v20  ;;  %v242_v52 = vsub.f32 %v1231_v46, %v241_v43  ;;  %v249_v53 = vsub.f32 %v1233_v47, %v248_v44  ;;  %v998_v58 = vpack.c.bf16 %v1197_v22, %v1193_v17 }
  0x29   :  { %1029 = vmatpush3.bf16.msra.mxu0 %v1249_v54  ;;  %975 = vmatpush3.bf16.msra.mxu1 %v1249_v54  ;;  %v229_v40 = vand.u32 4294901760, %v228_v35  ;;  %v236_v41 = vand.u32 4294901760, %v235_v36  ;;  %v1001_v59 = vpack.c.bf16 %v1201_v27, %v1199_v23  ;;  %v1004_v62 = vpack.c.bf16 %v1205_v29, %v1203_v28 }
  0x2a   :  { %1030 = vmatprep.subr.bf16.mxu0 %v1147_v2  ;;  %976 = vmatprep.subr.bf16.mxu1 %v1147_v2  ;;  %v989_v33 = vpack.c.bf16 %v222_v25, %v215_v24  ;;  %v243_v55 = vand.u32 4294901760, %v242_v52  ;;  %v250_v56 = vand.u32 4294901760, %v249_v53  ;;  %v1007_v63 = vpack.c.bf16 %v1213_v37, %v1211_v32 }
  0x2b   :  { %v992_v48 = vpack.c.bf16 %v236_v41, %v229_v40  ;;  %v1010_v3 = vpack.c.bf16 %v1219_v39, %v1217_v38  ;;  %v1013_v4 = vpack.c.bf16 %v1233_v47, %v1231_v46  ;;  %v37_v10 = vand.u32 127, %v36_v5 }
  0x2c   :  { %v995_v57 = vpack.c.bf16 %v250_v56, %v243_v55  ;;  %vm72_vm7 = vcmask 818176  }
  0x2d   :  { %1032 = vmatpush3.bf16.msra.mxu0 %v1263_v0  ;;  %978 = vmatpush3.bf16.msra.mxu1 %v1263_v0 }
  0x2e   :  { %898 = vmatprep.subr.mxu0 %v1151_v50  ;;  %811 = vmatprep.subr.mxu1 %v1151_v50 }
  0x31   :  { %899 = vmatpush3.msra.mxu0 %v1280_v11  ;;  %812 = vmatpush3.msra.mxu1 %v1280_v11 }
  0x32   :  { %1033 = vmatprep.subr.bf16.mxu0 %v1147_v2  ;;  %979 = vmatprep.subr.bf16.mxu1 %v1147_v2 }
  0x96   :  { %v40_v6 = vpop.permute.xlu0 %39  ;;  %v49_v9 = vpop.permute.xlu1 %48 }
  0x97   :  { %vm41_vm2 = vcmp.eq.s32.totalorder %v37_v10, %v40_v6  ;;  %vm50_vm5 = vcmp.eq.s32.totalorder %v37_v10, %v49_v9 }
  0x9b   :  { %v44_v12 = vpop.permute.xlu0 %43  ;;  %v54_v13 = vpop.permute.xlu1 %53 }
  0x9c   :  { %vm45_vm3 = vcmp.eq.s32.totalorder %v37_v10, %v44_v12  ;;  %vm55_vm4 = vcmp.eq.s32.totalorder %v37_v10, %v54_v13 }
  0x9d   :  { %vm46_vm6 = vmor %vm41_vm2, %vm45_vm3 }
  0x9e   :  { %vm51_vm8 = vmor %vm46_vm6, %vm50_vm5 }
  0x9f   :  { %vm56_vm9 = vmor %vm51_vm8, %vm55_vm4 }
  0xa0   :  { %v1317_v14 = vsel %vm56_vm9, 1.0, %v1151_v50 }
  0xa1   :  { %v74_v15 = vsel %vm72_vm7, %v1317_v14, 0 }
  0xa2   :  { %v1321_v19 = vsub.f32 %v74_v15, %v74_v15 }
  0xa4   :  { %v160_v20 = vand.u32 4294901760, %v1321_v19 }
  0xa6   :  { %901 = vmatmul.mubr.f32.vlgmr.msra.gmra.mrb[0].mxu0 %v160_v20  ;;  %v161_v24 = vsub.f32 %v1321_v19, %v160_v20 }
  0xa7   :  { %1035 = vmatpush3.bf16.msra.mxu0 %v1243_v51  ;;  %929 = vmatprep.mubr.msk.f32.mxu0 %vm1150_vm0, %v1151_v50  ;;  %v254_v51 = vsub.f32 %v1265_v1, %v1280_v11 }
  0xa8   :  { %1036 = vmatprep.subr.bf16.mxu0 %v1147_v2  ;;  %v162_v25 = vand.u32 4294901760, %v161_v24 }
  0xaa   :  { %814 = vmatmul.mubr.f32.vlgmr.msra.gmra.mrb[0].mxu1 %v162_v25 }
  0xab   :  { %981 = vmatpush3.bf16.msra.mxu1 %v1255_v60  ;;  %1038 = vmatpush3.bf16.msra.mxu0 %v1257_v61  ;;  %v255_v60 = vand.u32 4294901760, %v254_v51 }
  0xac   :  { %982 = vmatprep.subr.bf16.mxu1 %v1147_v2  ;;  %1039 = vmatprep.subr.bf16.mxu0 %v1147_v2 }
  0xad   :  { %842 = vmatprep.mubr.msk.f32.mxu1 %vm1150_vm0, %v1151_v50  ;;  %v256_v61 = vsub.f32 %v254_v51, %v255_v60 }
  0xaf   :  { %984 = vmatpush3.bf16.msra.mxu1 %v1271_v7  ;;  %1041 = vmatpush3.bf16.msra.mxu0 %v1273_v8  ;;  %v257_v1 = vand.u32 4294901760, %v256_v61 }
  0xb0   :  { %985 = vmatprep.subr.bf16.mxu1 %v1147_v2  ;;  %1042 = vmatprep.subr.bf16.mxu0 %v1147_v2 }
  0xb3   :  { %987 = vmatpush3.bf16.msra.mxu1 %v1286_v16  ;;  %1044 = vmatpush3.bf16.msra.mxu0 %v1288_v18 }
  0xb4   :  { %988 = vmatprep.subr.bf16.mxu1 %v1147_v2  ;;  %1045 = vmatprep.subr.bf16.mxu0 %v1147_v2 }
  0xb7   :  { %990 = vmatpush3.bf16.msra.mxu1 %v989_v33  ;;  %1047 = vmatpush3.bf16.msra.mxu0 %v1046_v34 }
  0xb8   :  { %991 = vmatprep.subr.bf16.mxu1 %v1147_v2  ;;  %1048 = vmatprep.subr.bf16.mxu0 %v1147_v2 }
  0xbb   :  { %993 = vmatpush3.bf16.msra.mxu1 %v992_v48  ;;  %1050 = vmatpush3.bf16.msra.mxu0 %v1049_v49 }
  0xbc   :  { %994 = vmatprep.subr.bf16.mxu1 %v1147_v2  ;;  %927 = vmatprep.subr.mxu0 %v1151_v50 }
  0xbf   :  { %996 = vmatpush3.bf16.msra.mxu1 %v995_v57  ;;  %928 = vmatpush3.msra.mxu0 %v255_v60 }
  0xc0   :  { %930 = vmatmul.mubr.msk.f32.vlgmr.msra.gmra.mrb[0].mxu0 %vm72_vm7, %v1317_v14  ;;  %1051 = vmatprep.subr.bf16.mxu0 %v1147_v2 }
  0xc1   :  { %1053 = vmatpush3.bf16.msra.mxu0 %v1195_v21  ;;  %840 = vmatprep.subr.mxu1 %v1151_v50 }
  0xc2   :  { %1054 = vmatprep.subr.bf16.mxu0 %v1147_v2  ;;  %958 = vmatprep.mubr.msk.f32.mxu0 %vm1150_vm0, %v1151_v50 }
  0xc3   :  { %841 = vmatpush3.msra.mxu1 %v257_v1 }
  0xc4   :  { %843 = vmatmul.mubr.msk.f32.vlgmr.msra.gmra.mrb[0].mxu1 %vm72_vm7, %v1317_v14  ;;  %997 = vmatprep.subr.bf16.mxu1 %v1147_v2 }
  0xc5   :  { %999 = vmatpush3.bf16.msra.mxu1 %v998_v58  ;;  %1056 = vmatpush3.bf16.msra.mxu0 %v1209_v30 }
  0xc6   :  { %1000 = vmatprep.subr.bf16.mxu1 %v1147_v2  ;;  %1057 = vmatprep.subr.bf16.mxu0 %v1147_v2 }
  0xc7   :  { %871 = vmatprep.mubr.msk.f32.mxu1 %vm1150_vm0, %v1151_v50 }
  0xc9   :  { %1002 = vmatpush3.bf16.msra.mxu1 %v1001_v59  ;;  %1059 = vmatpush3.bf16.msra.mxu0 %v1223_v42 }
  0xca   :  { %1003 = vmatprep.subr.bf16.mxu1 %v1147_v2  ;;  %1060 = vmatprep.subr.bf16.mxu0 %v1147_v2 }
  0xcd   :  { %1005 = vmatpush3.bf16.msra.mxu1 %v1004_v62  ;;  %1062 = vmatpush3.bf16.msra.mxu0 %v1229_v45 }
  0xce   :  { %1006 = vmatprep.subr.bf16.mxu1 %v1147_v2  ;;  %1063 = vmatprep.subr.bf16.mxu0 %v1147_v2 }
  0xd1   :  { %1008 = vmatpush3.bf16.msra.mxu1 %v1007_v63  ;;  %1065 = vmatpush3.bf16.msra.mxu0 %v1249_v54 }
  0xd2   :  { %1009 = vmatprep.subr.bf16.mxu1 %v1147_v2  ;;  %1066 = vmatprep.subr.bf16.mxu0 %v1147_v2 }
  0xd5   :  { %1011 = vmatpush3.bf16.msra.mxu1 %v1010_v3  ;;  %1068 = vmatpush3.bf16.msra.mxu0 %v1263_v0 }
  0xd6   :  { %1012 = vmatprep.subr.bf16.mxu1 %v1147_v2  ;;  %956 = vmatprep.subr.mxu0 %v1151_v50 }
  0xd9   :  { %1014 = vmatpush3.bf16.msra.mxu1 %v1013_v4  ;;  %957 = vmatpush3.msra.mxu0 %v1280_v11 }
  0xda   :  { %959 = vmatmul.mubr.msk.f32.vlgmr.msra.gmra.mrb[0].mxu0 %vm72_vm7, %v1317_v14  ;;  %869 = vmatprep.subr.mxu1 %v1151_v50 }
  0xdd   :  { %870 = vmatpush3.msra.mxu1 %v254_v51 }
  0xde   :  { %872 = vmatmul.mubr.f32.vlgmr.msra.gmra.mrb[0].mxu1 %v1321_v19 }
 0x1ad   :  { %v678_v17 = vpop.f32.mrb[0].mxu0 }
 0x1ae   :  { %v960_v21 = vpop.f32.mrb[1].mxu0 }
 0x1b1   :  { %v398_v2 = vpop.f32.mrb[0].mxu1 }
 0x1b2   :  { %v1069_v22 = vadd.f32 %v678_v17, %v398_v2  ;;  %v873_v23 = vpop.f32.mrb[1].mxu1 }
 0x1b4   :  { %682 = vst [vmem:[#allocation5] sm:$0xff] %v1069_v22 }
 0x1b5   :  { %1127 = shalt.err (!%p1124_p12)
}
 0x1b6   :  { %s1128_s5 = scalar_lea.hbm %s1415_s3, 128 }
 0x1b7   :  { %p1129_p13 = scmp.ne.s32.totalorder %s1415_s3, %s1128_s5  ;;  %p1132_p0 = scmp.lt.u32.totalorder %s1128_s5, %s1415_s3 }
 0x1b9   :  { %p1134_p1 = pnand %p1132_p0, %p1129_p13 }
 0x1bb   :  { %1137 = shalt.err (!%p1134_p1)
}
 0x1bc   :  { %692 = dma.vmem_to_hbm [thread:$0]  %s690_s1, 128, %s1415_s3, [#allocation4]  }
 0x1bd   :  { %1140 = dma.done.wait [#allocation4], 128  }
 0x1be   :  { %1141 = vsyncadd [#allocation4], 4294967168 }
 0x1bf   :  { %696 = vsyncpa [#allocation3], 1 }
 0x1c0   :  { %697 = vsyncpa [#allocation4], 1 }

</bundles_post_ra>
